<compile_context>
chip_gen: v6e
topology: v6e:2x2x1
jax: 0.10.0
libtpu: 0.0.40
codegen_flags: <defaults>
</compile_context>

<pallas_src>
import functools

import jax
import jax.numpy as jnp
import numpy as np
from jax.experimental import pallas as pl
from jax.experimental.pallas import tpu as pltpu

IN_DIM = 2        # in_dim of the first LogicLayer (after Flatten)
K = 4             # num_neurons
NUM_LAYERS = 2    # num_layers
CLASS_COUNT = 2   # GroupSum k
TAU = 1.0

# Every soft logic gate op_i(a, b) is affine in (1, a, b, a*b).
# Rows = gate index 0..15, columns = coefficients of [1, a, b, a*b].
_GATE_AFFINE = np.array([
    [0,  0,  0,  0],   # 0: False
    [0,  0,  0,  1],   # 1: a AND b
    [0,  1,  0, -1],   # 2: a AND NOT b
    [0,  1,  0,  0],   # 3: a
    [0,  0,  1, -1],   # 4: NOT a AND b
    [0,  0,  1,  0],   # 5: b
    [0,  1,  1, -2],   # 6: a XOR b
    [0,  1,  1, -1],   # 7: a OR b
    [1, -1, -1,  1],   # 8: NOR
    [1, -1, -1,  2],   # 9: XNOR
    [1,  0, -1,  0],   # 10: NOT b
    [1,  0, -1,  1],   # 11: a OR NOT b
    [1, -1,  0,  0],   # 12: NOT a
    [1, -1,  0,  1],   # 13: NOT a OR b
    [1,  0,  0, -1],   # 14: NAND
    [1,  0,  0,  0],   # 15: True
], dtype=np.float32)                                   # (16, 4)


def gate_coeffs(w_soft):
    """(16, K) softmaxed gate weights -> (K, 4) affine coefficients."""
    return jnp.asarray(w_soft).T @ jnp.asarray(_GATE_AFFINE)


def difflogic_kernel(x_ref, selab1_ref, coef1_ref, selab2_ref, coef2_ref,
                     grp_ref, o_ref):
    x = x_ref[...]                                            # (IN_DIM, tb)

    # ---- LogicLayer 1: fused a/b one-hot gather (single MXU pass) ----
    ab1 = jnp.dot(selab1_ref[...], x,
                  preferred_element_type=jnp.float32)         # (2K, tb)
    a1 = ab1[:K, :]
    b1 = ab1[K:, :]
    c1 = coef1_ref[...]                                       # (K, 4)
    h1 = (c1[:, 0:1] + c1[:, 1:2] * a1 + c1[:, 2:3] * b1
          + c1[:, 3:4] * (a1 * b1))                           # (K, tb)

    # ---- LogicLayer 2 ----
    ab2 = jnp.dot(selab2_ref[...], h1,
                  preferred_element_type=jnp.float32)         # (2K, tb)
    a2 = ab2[:K, :]
    b2 = ab2[K:, :]
    c2 = coef2_ref[...]                                       # (K, 4)
    h2 = (c2[:, 0:1] + c2[:, 1:2] * a2 + c2[:, 2:3] * b2
          + c2[:, 3:4] * (a2 * b2))                           # (K, tb)

    # ---- GroupSum (1/tau already folded into grp) ----
    o_ref[...] = jnp.dot(grp_ref[...], h2,
                         preferred_element_type=jnp.float32)  # (CLASS_COUNT, tb)


def difflogic_forward(x, sel_ab1, coef1, sel_ab2, coef2, group_mat, *, tb=256):
    """x: (B, IN_DIM) fp32 -> (B, CLASS_COUNT) fp32."""
    B = x.shape[0]
    assert B % tb == 0, "batch must be divisible by the batch tile"
    assert tb % 128 == 0, "batch tile must be lane-aligned (multiple of 128)"

    # Layout plumbing (wrapper-side): batch on the 128-lane axis.
    xt = x.T                                                  # (IN_DIM, B)
    grid = (B // tb,)

    def batch_map(i):
        return (0, i)

    def const_map(i):
        return (0, 0)

    out_t = pl.pallas_call(
        difflogic_kernel,
        out_shape=jax.ShapeDtypeStruct((CLASS_COUNT, B), jnp.float32),
        grid=grid,
        in_specs=[
            pl.BlockSpec((IN_DIM, tb), batch_map),
            pl.BlockSpec(sel_ab1.shape, const_map),
            pl.BlockSpec(coef1.shape, const_map),
            pl.BlockSpec(sel_ab2.shape, const_map),
            pl.BlockSpec(coef2.shape, const_map),
            pl.BlockSpec(group_mat.shape, const_map),
        ],
        out_specs=pl.BlockSpec((CLASS_COUNT, tb), batch_map),
        compiler_params=pltpu.CompilerParams(
            dimension_semantics=("parallel",)),
    )(xt, sel_ab1, coef1, sel_ab2, coef2, group_mat)
    return out_t.T                                            # (B, CLASS_COUNT)


def ref_forward(x, idx_a1, idx_b1, w1_soft, idx_a2, idx_b2, w2_soft):
    """Pure-JAX reference matching difflogic's training-mode forward (16 gates)."""
    def layer(h, ia, ib, ws):  # ws: (16, K)
        a = h[:, ia]
        b = h[:, ib]
        ab = a * b
        one = jnp.ones_like(a)
        zero = jnp.zeros_like(a)
        ops = jnp.stack([
            zero, ab, a - ab, a, b - ab, b,
            a + b - 2.0 * ab, a + b - ab,
            one - (a + b - ab), one - (a + b - 2.0 * ab),
            one - b, one - b + ab, one - a, one - a + ab,
            one - ab, one,
        ], axis=0)                                     # (16, B, K)
        return jnp.sum(ops * ws[:, None, :], axis=0)   # (B, K)

    h1 = layer(x, idx_a1, idx_b1, w1_soft)
    h2 = layer(h1, idx_a2, idx_b2, w2_soft)
    B = x.shape[0]
    return h2.reshape(B, CLASS_COUNT, K // CLASS_COUNT).sum(-1) / TAU


if __name__ == "__main__":
    key = jax.random.PRNGKey(0)
    kx, ka1, kb1, kw1, ka2, kb2, kw2 = jax.random.split(key, 7)

    # Deterministic synthetic parameters (shapes from LogicLayer.__init__):
    #   indices: random connections in [0, in_dim); weights: randn(out_dim, 16)
    idx_a1 = jax.random.randint(ka1, (K,), 0, IN_DIM)
    idx_b1 = jax.random.randint(kb1, (K,), 0, IN_DIM)
    idx_a2 = jax.random.randint(ka2, (K,), 0, K)
    idx_b2 = jax.random.randint(kb2, (K,), 0, K)
    w1 = jax.random.normal(kw1, (K, 16), dtype=jnp.float32)
    w2 = jax.random.normal(kw2, (K, 16), dtype=jnp.float32)

    # Plain-JAX parameter prep (glue): softmax over the 16 gate logits
    # (training-mode forward), collapsed to 4 affine coefficients per neuron;
    # fused one-hot selection matrices; GroupSum as a matmul with 1/tau folded.
    w1_soft = jax.nn.softmax(w1, axis=-1).T            # (16, K)
    w2_soft = jax.nn.softmax(w2, axis=-1).T            # (16, K)
    coef1 = gate_coeffs(w1_soft)                       # (K, 4)
    coef2 = gate_coeffs(w2_soft)                       # (K, 4)
    sel_ab1 = jnp.concatenate([
        jax.nn.one_hot(idx_a1, IN_DIM, dtype=jnp.float32),
        jax.nn.one_hot(idx_b1, IN_DIM, dtype=jnp.float32)], axis=0)  # (2K, IN_DIM)
    sel_ab2 = jnp.concatenate([
        jax.nn.one_hot(idx_a2, K, dtype=jnp.float32),
        jax.nn.one_hot(idx_b2, K, dtype=jnp.float32)], axis=0)       # (2K, K)
    group_mat = (jax.nn.one_hot(
        jnp.arange(K) // (K // CLASS_COUNT), CLASS_COUNT,
        dtype=jnp.float32).T / TAU)                                  # (CLASS_COUNT, K)

    # Input: batch of samples with 2 features (Flatten is a no-op here).
    # tb=256 (lane-aligned) and 4 parallel grid steps (keeps both v7x TCs busy).
    B = 1024
    x = jax.random.uniform(kx, (B, IN_DIM), dtype=jnp.float32)

    fwd = jax.jit(functools.partial(difflogic_forward, tb=256))
    out = fwd(x, sel_ab1, coef1, sel_ab2, coef2, group_mat)
    out = jax.block_until_ready(out)

    ref = ref_forward(x, idx_a1, idx_b1, w1_soft, idx_a2, idx_b2, w2_soft)
    np.testing.assert_allclose(np.asarray(out), np.asarray(ref),
                               rtol=1e-5, atol=1e-5)
    print("KERNEL_OK")
</pallas_src>

<mosaic_0001>
module attributes {stable_mosaic.version = 11 : i64} {
  func.func @difflogic_kernel(%arg0: i32, %arg1: memref<2x256xf32, #tpu.memory_space<vmem>>, %arg2: memref<8x2xf32, #tpu.memory_space<vmem>>, %arg3: memref<4x4xf32, #tpu.memory_space<vmem>>, %arg4: memref<8x4xf32, #tpu.memory_space<vmem>>, %arg5: memref<4x4xf32, #tpu.memory_space<vmem>>, %arg6: memref<2x4xf32, #tpu.memory_space<vmem>>, %arg7: memref<2x256xf32, #tpu.memory_space<vmem>>) attributes {dimension_semantics = [#tpu.dimension_semantics<parallel>], iteration_bounds = array<i64: 4>, scalar_prefetch = 0 : i64, scratch_operands = 0 : i64, tpu.core_type = #tpu.core_type<tc>, window_params = [{transform_indices = @transform_0, window_bounds = array<i64: 2, 256>}, {pipeline_mode = #tpu.pipeline_mode<synchronous>, transform_indices = @transform_1, window_bounds = array<i64: 8, 2>}, {pipeline_mode = #tpu.pipeline_mode<synchronous>, transform_indices = @transform_2, window_bounds = array<i64: 4, 4>}, {pipeline_mode = #tpu.pipeline_mode<synchronous>, transform_indices = @transform_3, window_bounds = array<i64: 8, 4>}, {pipeline_mode = #tpu.pipeline_mode<synchronous>, transform_indices = @transform_4, window_bounds = array<i64: 4, 4>}, {pipeline_mode = #tpu.pipeline_mode<synchronous>, transform_indices = @transform_5, window_bounds = array<i64: 2, 4>}, {transform_indices = @transform_6, window_bounds = array<i64: 2, 256>}]} {
    %c0 = arith.constant 0 : index
    %c0_0 = arith.constant 0 : index
    %0 = vector.load %arg1[%c0, %c0_0] : memref<2x256xf32, #tpu.memory_space<vmem>>, vector<2x256xf32>
    %c0_1 = arith.constant 0 : index
    %c0_2 = arith.constant 0 : index
    %1 = vector.load %arg2[%c0_1, %c0_2] : memref<8x2xf32, #tpu.memory_space<vmem>>, vector<8x2xf32>
    %cst = arith.constant dense<0.000000e+00> : vector<8x256xf32>
    %2 = tpu.matmul %1, %0, %cst {dimension_numbers = #tpu.dot_dimension_numbers<[1], [0], [0], [1], [0, 0, 1, 1], [], []>} : vector<8x2xf32>, vector<2x256xf32>, vector<8x256xf32> -> vector<8x256xf32>
    %3 = vector.extract_strided_slice %2 {offsets = [0, 0], sizes = [4, 256], strides = [1, 1]} : vector<8x256xf32> to vector<4x256xf32>
    %4 = vector.extract_strided_slice %2 {offsets = [4, 0], sizes = [4, 256], strides = [1, 1]} : vector<8x256xf32> to vector<4x256xf32>
    %c0_3 = arith.constant 0 : index
    %c0_4 = arith.constant 0 : index
    %5 = vector.load %arg3[%c0_3, %c0_4] : memref<4x4xf32, #tpu.memory_space<vmem>>, vector<4x4xf32>
    %6 = vector.extract_strided_slice %5 {offsets = [0, 0], sizes = [4, 1], strides = [1, 1]} : vector<4x4xf32> to vector<4x1xf32>
    %7 = vector.extract_strided_slice %5 {offsets = [0, 1], sizes = [4, 1], strides = [1, 1]} : vector<4x4xf32> to vector<4x1xf32>
    %8 = vector.broadcast %7 : vector<4x1xf32> to vector<4x256xf32>
    %9 = arith.mulf %8, %3 : vector<4x256xf32>
    %10 = vector.broadcast %6 : vector<4x1xf32> to vector<4x256xf32>
    %11 = arith.addf %10, %9 : vector<4x256xf32>
    %12 = vector.extract_strided_slice %5 {offsets = [0, 2], sizes = [4, 1], strides = [1, 1]} : vector<4x4xf32> to vector<4x1xf32>
    %13 = vector.broadcast %12 : vector<4x1xf32> to vector<4x256xf32>
    %14 = arith.mulf %13, %4 : vector<4x256xf32>
    %15 = arith.addf %11, %14 : vector<4x256xf32>
    %16 = vector.extract_strided_slice %5 {offsets = [0, 3], sizes = [4, 1], strides = [1, 1]} : vector<4x4xf32> to vector<4x1xf32>
    %17 = arith.mulf %3, %4 : vector<4x256xf32>
    %18 = vector.broadcast %16 : vector<4x1xf32> to vector<4x256xf32>
    %19 = arith.mulf %18, %17 : vector<4x256xf32>
    %20 = arith.addf %15, %19 : vector<4x256xf32>
    %c0_5 = arith.constant 0 : index
    %c0_6 = arith.constant 0 : index
    %21 = vector.load %arg4[%c0_5, %c0_6] : memref<8x4xf32, #tpu.memory_space<vmem>>, vector<8x4xf32>
    %cst_7 = arith.constant dense<0.000000e+00> : vector<8x256xf32>
    %22 = tpu.matmul %21, %20, %cst_7 {dimension_numbers = #tpu.dot_dimension_numbers<[1], [0], [0], [1], [0, 0, 1, 1], [], []>} : vector<8x4xf32>, vector<4x256xf32>, vector<8x256xf32> -> vector<8x256xf32>
    %23 = vector.extract_strided_slice %22 {offsets = [0, 0], sizes = [4, 256], strides = [1, 1]} : vector<8x256xf32> to vector<4x256xf32>
    %24 = vector.extract_strided_slice %22 {offsets = [4, 0], sizes = [4, 256], strides = [1, 1]} : vector<8x256xf32> to vector<4x256xf32>
    %c0_8 = arith.constant 0 : index
    %c0_9 = arith.constant 0 : index
    %25 = vector.load %arg5[%c0_8, %c0_9] : memref<4x4xf32, #tpu.memory_space<vmem>>, vector<4x4xf32>
    %26 = vector.extract_strided_slice %25 {offsets = [0, 0], sizes = [4, 1], strides = [1, 1]} : vector<4x4xf32> to vector<4x1xf32>
    %27 = vector.extract_strided_slice %25 {offsets = [0, 1], sizes = [4, 1], strides = [1, 1]} : vector<4x4xf32> to vector<4x1xf32>
    %28 = vector.broadcast %27 : vector<4x1xf32> to vector<4x256xf32>
    %29 = arith.mulf %28, %23 : vector<4x256xf32>
    %30 = vector.broadcast %26 : vector<4x1xf32> to vector<4x256xf32>
    %31 = arith.addf %30, %29 : vector<4x256xf32>
    %32 = vector.extract_strided_slice %25 {offsets = [0, 2], sizes = [4, 1], strides = [1, 1]} : vector<4x4xf32> to vector<4x1xf32>
    %33 = vector.broadcast %32 : vector<4x1xf32> to vector<4x256xf32>
    %34 = arith.mulf %33, %24 : vector<4x256xf32>
    %35 = arith.addf %31, %34 : vector<4x256xf32>
    %36 = vector.extract_strided_slice %25 {offsets = [0, 3], sizes = [4, 1], strides = [1, 1]} : vector<4x4xf32> to vector<4x1xf32>
    %37 = arith.mulf %23, %24 : vector<4x256xf32>
    %38 = vector.broadcast %36 : vector<4x1xf32> to vector<4x256xf32>
    %39 = arith.mulf %38, %37 : vector<4x256xf32>
    %40 = arith.addf %35, %39 : vector<4x256xf32>
    %c0_10 = arith.constant 0 : index
    %c0_11 = arith.constant 0 : index
    %41 = vector.load %arg6[%c0_10, %c0_11] : memref<2x4xf32, #tpu.memory_space<vmem>>, vector<2x4xf32>
    %cst_12 = arith.constant dense<0.000000e+00> : vector<2x256xf32>
    %42 = tpu.matmul %41, %40, %cst_12 {dimension_numbers = #tpu.dot_dimension_numbers<[1], [0], [0], [1], [0, 0, 1, 1], [], []>} : vector<2x4xf32>, vector<4x256xf32>, vector<2x256xf32> -> vector<2x256xf32>
    %c0_13 = arith.constant 0 : index
    %c0_14 = arith.constant 0 : index
    %43 = vector.load %arg7[%c0_13, %c0_14] : memref<2x256xf32, #tpu.memory_space<vmem>>, vector<2x256xf32>
    tpu.vector_store %arg7[%c0_13, %c0_14], %42 {strides = array<i32>} : memref<2x256xf32, #tpu.memory_space<vmem>>, vector<2x256xf32>,
    return
  }
  func.func @transform_0(%arg0: i32) -> (i32, i32) {
    %c0_i32 = arith.constant 0 : i32
    %c0_i32_0 = arith.constant 0 : i32
    return %c0_i32, %arg0 : i32, i32
  }
  func.func @transform_1(%arg0: i32) -> (i32, i32) {
    %c0_i32 = arith.constant 0 : i32
    %c0_i32_0 = arith.constant 0 : i32
    %c0_i32_1 = arith.constant 0 : i32
    return %c0_i32, %c0_i32_0 : i32, i32
  }
  func.func @transform_2(%arg0: i32) -> (i32, i32) {
    %c0_i32 = arith.constant 0 : i32
    %c0_i32_0 = arith.constant 0 : i32
    %c0_i32_1 = arith.constant 0 : i32
    return %c0_i32, %c0_i32_0 : i32, i32
  }
  func.func @transform_3(%arg0: i32) -> (i32, i32) {
    %c0_i32 = arith.constant 0 : i32
    %c0_i32_0 = arith.constant 0 : i32
    %c0_i32_1 = arith.constant 0 : i32
    return %c0_i32, %c0_i32_0 : i32, i32
  }
  func.func @transform_4(%arg0: i32) -> (i32, i32) {
    %c0_i32 = arith.constant 0 : i32
    %c0_i32_0 = arith.constant 0 : i32
    %c0_i32_1 = arith.constant 0 : i32
    return %c0_i32, %c0_i32_0 : i32, i32
  }
  func.func @transform_5(%arg0: i32) -> (i32, i32) {
    %c0_i32 = arith.constant 0 : i32
    %c0_i32_0 = arith.constant 0 : i32
    %c0_i32_1 = arith.constant 0 : i32
    return %c0_i32, %c0_i32_0 : i32, i32
  }
  func.func @transform_6(%arg0: i32) -> (i32, i32) {
    %c0_i32 = arith.constant 0 : i32
    %c0_i32_0 = arith.constant 0 : i32
    return %c0_i32, %arg0 : i32, i32
  }
}

</mosaic_0001>

<bundles_post_ra>
// kernel: difflogic_forward.1
= control target key start
LH: loop header
LB: loop body
LE: loop exit
PB: predicated region body
PF: predicated region fallthrough
CT: control target
= control target key end

     0   :  { %11 = vsyncpa [#allocation3], 0  ;;  %s955_s0 = inlined_call_operand.vmem [shape: f32[2,1024], index: 0, kind: input, shape index: {}]   ;;  %s956_s1 = inlined_call_operand.vmem [shape: f32[8,2], index: 1, kind: input, shape index: {}]   ;;  %s957_s2 = inlined_call_operand.vmem [shape: f32[4,4], index: 2, kind: input, shape index: {}]   ;;  %s958_s3 = inlined_call_operand.vmem [shape: f32[8,4], index: 3, kind: input, shape index: {}]   ;;  %s959_s4 = inlined_call_operand.vmem [shape: f32[4,4], index: 4, kind: input, shape index: {}]   ;;  %s960_s5 = inlined_call_operand.vmem [shape: f32[2,4], index: 5, kind: input, shape index: {}]   ;;  %s961_s6 = inlined_call_operand.hbm [shape: f32[2,1024], index: 6, kind: output, shape index: {}]  }
   0x1   :  { %13 = vsyncpa [#allocation3 + $0x1], 0  ;;  %s848_s21 = smov 0   ;;  %s850_s22 = smov 0  }
   0x2   :  { %s852_s23 = smov 0   ;;  %s854_s24 = smov 0  }
   0x3 LB: > { %s869_s25 = sadd.s32 4294967295, %s805_s24   ;;  %s670_s26 = sadd.s32 4294967294, %s805_s24   ;;  %s805_s24 = sphi %s854_s24, %s967_s24   ;;  %s801_s23 = sphi %s852_s23, %s966_s23   ;;  %s797_s22 = sphi %s850_s22, %s965_s22   ;;  %s793_s21 = sphi %s848_s21, %s964_s21  }
   0x4   : > { %s873_s27 = sadd.s32 1, %s805_s24   ;;  %s157_s28 = sadd.s32 1, %s801_s23 }
   0x5   : > { %s154_s29 = ssub.s32 %s805_s24, %s873_s27  ;;  %p167_p0 = scmp.ne.s32.totalorder %s801_s23, %s797_s22 }
   0x6   : > { %p155_p1 = scmp.eq.s32.totalorder %s154_s29, 0  ;;  %p168_p2 = scmp.eq.s32.totalorder %s869_s25, 3 }
   0x7   : > { %p173_p3 = scmp.ne.s32.totalorder %s797_s22, %s793_s21  ;;  %p174_p4 = scmp.eq.s32.totalorder %s670_s26, 3 }
   0x8   : > { %s884_s30 = scalar_select %p155_p1, %s801_s23, %s157_s28  }
   0x9   : > { %p886_p5 = por %p168_p2, %p167_p0  ;;  %p890_p6 = por %p174_p4, %p173_p3 }
   0xa   : > { %p673_p7 = scmp.ge.s32.totalorder %s805_s24, 1  ;;  %p216_p8 = scmp.lt.s32.totalorder %s805_s24, 5 }
   0xc   : > { %p217_p9 = pnand %p673_p7, %p216_p8 }
   0xd   : > { %s675_s9 = sshll.u32 (!%p217_p9), %s869_s25, 1  ;;  %s693_s11 = sshll.u32 (!%p217_p9), %s869_s25, 6 }
   0xe   : > { %220 = sbr.rel (%p217_p9) target bundleno = 649 (0x289), region = 44  ;;  %p247_p10 = scmp.lt.s32.totalorder (!%p217_p9), %s675_s9, 7 }
   0xf   : > { %s609_s16 = scalar_lea.hbm (!%p217_p9), %s961_s6, %s693_s11  ;;  %s812_s19 = smov (!%p217_p9), [#allocation2]  }
  0x10   : > { %s749_s20 = sshll.u32 (!%p217_p9), %s812_s19, 4  ;;  %s750_s20 = int_to_ptr.vmem [resolvable:$false] %s749_s20 }
  0x11   : > { %s751_s25 = scalar_lea.vmem (!%p217_p9), %s750_s20, 128 }
  0x13   : > { %v807_v0 = vmov 0.0   ;;  %v808_v1 = vmov 1   ;;  %v344_v2 = vld [vmem:[%s957_s2] sm:$0xf]  ;;  %v809_v3 = vmov 2   ;;  %s969_s9 = smov (!%p247_p10, %s675_s9), 7 }
  0x14   : > { %337 = vmatprep.mubr.f32.mxu0 %v807_v0  ;;  %738 = vset.pattern.permute.xlu0 %v808_v1  ;;  %s676_s12 = sshll.u32 %s969_s9, 1  ;;  %v810_v4 = vmov 0   ;;  %vm268_vm0 = vcmask 1041408   ;;  %v811_v6 = vmov 3   ;;  %v465_v8 = vld [vmem:[%s959_s4] sm:$0xf] }
  0x15   : > { %347 = vperm.xlu0 %738, %v344_v2   ;;  %740 = vset.pattern.permute.xlu1 %v809_v3  ;;  %s250_s15 = scalar_lea.vmem %s955_s0, %s676_s12  ;;  %v254_v9 = vld [vmem:[%s956_s1] sm:$0xff]  ;;  %vm264_vm1 = vcmask 15360   ;;  %vm387_vm2 = vcmask 1043456   ;;  %vm383_vm3 = vcmask 31744   ;;  %s243_s9 = sand.u32 1, %s797_s22  }
  0x16   : > { %359 = vperm.xlu1 %740, %v344_v2   ;;  %458 = vmatprep.mubr.f32.mxu1 %v807_v0  ;;  %v677_v5 = vld.sshfl [vmem:[%s250_s15] sm:$0x33 pattern:$0x76325410]  ;;  %s674_s10 = sshll.u32 %s243_s9, 2  ;;  %s597_s17 = scalar_lea.sflag [#allocation3], %s243_s9 }
  0x17   : > { %v263_v7 = vcombine.high %v677_v5, %v677_v5  ;;  %v382_v32 = vld [vmem:[%s958_s3] sm:$0xff]  ;;  %s245_s12 = scalar_lea.vmem [#allocation2], %s674_s10 }
  0x18   : > { %v503_v55 = vld [vmem:[%s960_s5] sm:$0x3]  ;;  %s611_s13 = sshll.u32 %s245_s12, 4  ;;  %s612_s13 = int_to_ptr.vmem [resolvable:$true] %s611_s13 }
  0x19   : > { %739 = vset.pattern.permute.xlu0 %v810_v4  ;;  %678 = vmatprep.subr.msk.mxu0 %vm268_vm0, %v263_v7  ;;  %s745_s18 = scalar_lea.vmem %s612_s13, 64  ;;  %p752_p0 = scmp.lt.s32.totalorder %s612_s13, %s750_s20 }
  0x1a   : > { %353 = vperm.xlu0 %739, %v344_v2   ;;  %741 = vset.pattern.permute.xlu1 %v811_v6  ;;  %p746_p11 = scmp.ne.s32.totalorder %s612_s13, %s745_s18  ;;  %p753_p1 = scmp.lt.s32.totalorder %s751_s25, %s745_s18 }
  0x1b   : > { %375 = vperm.xlu1 %741, %v344_v2   ;;  %679 = vmatpush1.msk.msra.mxu0 %vm268_vm0, %v677_v5 }
  0x1c   : > { %680 = vmatmul.mubr.msk.f32.vlgmr.msra.gmra.mxu0 %vm264_vm1, %v254_v9  ;;  %p747_p12 = pnand %p746_p11, %p886_p5  ;;  %p754_p2 = por %p753_p1, %p752_p0 }
  0x1d   : > { %577 = vmatprep.mubr.f32.mxu0 %v807_v0 }
  0x1e   : > { %474 = vperm.xlu0 %739, %v465_v8   ;;  %p748_p13 = pneg %p747_p12 }
  0x1f   : > { %742 = vset.pattern.permute.xlu1 %v808_v1 }
  0x20   : > { %468 = vperm.xlu1 %742, %v465_v8   ;;  %p755_p3 = pnand %p754_p2, %p748_p13 }
  0x22   : > { %744 = vset.pattern.permute.xlu0 %v811_v6 }
  0x23   : > { %496 = vperm.xlu0 %744, %v465_v8  }
  0x24   : > { %743 = vset.pattern.permute.xlu1 %v809_v3 }
  0x25   : > { %480 = vperm.xlu1 %743, %v465_v8  }
  0x90   : > { %v348_v10 = vpop.permute.xlu0 %347 }
  0x91   : > { %v360_v11 = vpop.permute.xlu1 %359 }
  0x95   : > { %v354_v15 = vpop.permute.xlu0 %353 }
  0x96   : > { %v376_v22 = vpop.permute.xlu1 %375 }
  0x99   : > { %v475_v34 = vpop.permute.xlu0 %474 }
  0x9b   : > { %v469_v33 = vpop.permute.xlu1 %468 }
  0x9e   : > { %v497_v44 = vpop.permute.xlu0 %496 }
  0xa0   : > { %v481_v36 = vpop.permute.xlu1 %480 }
  0xdc   : > { %v339_v12 = vpop.f32.mrf.mxu0 }
  0xdd   : > { %v350_v13 = vmul.f32 %v348_v10, %v339_v12  ;;  %v364_v14 = vrot.slane %v339_v12, 4 }
  0xde   : > { %v341_v16 = vpop.f32.mrf.mxu0 }
  0xdf   : > { %v356_v17 = vadd.f32 %v354_v15, %v350_v13  ;;  %v368_v18 = vmul.f32 %v364_v14, %v360_v11  ;;  %v372_v19 = vmul.f32 %v364_v14, %v339_v12  ;;  %v351_v20 = vmul.f32 %v348_v10, %v341_v16 }
  0xe0   : > { %v365_v21 = vrot.slane %v341_v16, 4 }
  0xe1   : > { %v357_v23 = vadd.f32 %v354_v15, %v351_v20  ;;  %v370_v26 = vadd.f32 %v368_v18, %v356_v17  ;;  %v378_v27 = vmul.f32 %v376_v22, %v372_v19 }
  0xe2   : > { %v373_v24 = vmul.f32 %v365_v21, %v341_v16  ;;  %v369_v25 = vmul.f32 %v365_v21, %v360_v11 }
  0xe3   : > { %v380_v31 = vadd.f32 %v378_v27, %v370_v26 }
  0xe4   : > { %v379_v28 = vmul.f32 %v376_v22, %v373_v24  ;;  %v371_v29 = vadd.f32 %v369_v25, %v357_v23 }
  0xe6   : > { %v381_v30 = vadd.f32 %v379_v28, %v371_v29 }
  0xe8   : > { %681 = vmatprep.subr.msk.mxu1 %vm387_vm2, %v381_v30 }
  0xe9   : > { %682 = vmatpush1.msk.msra.mxu1 %vm387_vm2, %v380_v31 }
  0xea   : > { %683 = vmatmul.mubr.msk.f32.vlgmr.msra.gmra.mxu1 %vm383_vm3, %v382_v32 }
 0x1aa   : > { %v460_v35 = vpop.f32.mrf.mxu1 }
 0x1ab   : > { %v471_v37 = vmul.f32 %v469_v33, %v460_v35  ;;  %v485_v38 = vrot.slane %v460_v35, 4 }
 0x1ac   : > { %v462_v39 = vpop.f32.mrf.mxu1 }
 0x1ad   : > { %v477_v40 = vadd.f32 %v475_v34, %v471_v37  ;;  %v489_v41 = vmul.f32 %v485_v38, %v481_v36  ;;  %v472_v42 = vmul.f32 %v469_v33, %v462_v39  ;;  %v486_v43 = vrot.slane %v462_v39, 4 }
 0x1ae   : > { %v493_v45 = vmul.f32 %v485_v38, %v460_v35 }
 0x1af   : > { %v478_v46 = vadd.f32 %v475_v34, %v472_v42  ;;  %v490_v47 = vmul.f32 %v486_v43, %v481_v36  ;;  %v494_v48 = vmul.f32 %v486_v43, %v462_v39  ;;  %v491_v49 = vadd.f32 %v489_v41, %v477_v40 }
 0x1b0   : > { %v499_v50 = vmul.f32 %v497_v44, %v493_v45 }
 0x1b1   : > { %v492_v51 = vadd.f32 %v490_v47, %v478_v46  ;;  %v500_v52 = vmul.f32 %v497_v44, %v494_v48 }
 0x1b2   : > { %v501_v54 = vadd.f32 %v499_v50, %v491_v49 }
 0x1b3   : > { %v502_v53 = vadd.f32 %v500_v52, %v492_v51 }
 0x1b5   : > { %684 = vmatprep.subr.msk.mxu0 %vm387_vm2, %v502_v53 }
 0x1b6   : > { %685 = vmatpush1.msk.msra.mxu0 %vm387_vm2, %v501_v54 }
 0x1b7   : > { %686 = vmatmul.mubr.msk.f32.vlgmr.msra.gmra.mxu0 %vm383_vm3, %v503_v55 }
 0x277   : > { %v579_v56 = vpop.f32.mrf.mxu0 }
 0x279   : > { %v581_v57 = vpop.f32.mrf.mxu0 }
 0x27a   : > { %v586_v58 = vcombine.low %v579_v56, %v581_v57 }
 0x27c   : > { %687 = vst.sshfl [vmem:[%s245_s12] sm:$0x33 pattern:$0x76325410] %v586_v58 }
 0x27d   : > { %758 = shalt.err (!%p755_p3)
}
 0x27e   : > { %s759_s26 = scalar_lea.hbm %s609_s16, 64  ;;  %s763_s9 = scalar_lea.hbm %s961_s6, 256 }
 0x27f   : > { %p760_p4 = scmp.ne.s32.totalorder %s609_s16, %s759_s26  ;;  %p764_p9 = scmp.lt.s32.totalorder %s609_s16, %s961_s6 }
 0x280   : > { %p765_p10 = scmp.lt.s32.totalorder %s763_s9, %s759_s26 }
 0x281   : > { %p761_p7 = pnand %p760_p4, %p886_p5 }
 0x282   : > { %p766_p11 = por %p765_p10, %p764_p9 }
 0x283   : > { %p762_p8 = pneg %p761_p7 }
 0x285   : > { %p767_p12 = pnand %p766_p11, %p762_p8 }
 0x287   : > { %770 = shalt.err (!%p767_p12)
}
 0x288   : > { %694 = dma.vmem_to_hbm [thread:$0]  (%p886_p5), %s612_s13, 64, %s609_s16, %s597_s17  }
 0x289 PF: > { %p700_p13 = scmp.ge.s32.totalorder %s805_s24, 2  ;;  %s623_s12 = sand.u32 1, %s793_s21  }
 0x28a   : > { %s624_s14 = scalar_lea.sflag [#allocation3], %s623_s12 }
 0x28b   : > { %p697_p0 = pnand %p700_p13, %p890_p6 }
 0x28d   : > { %p698_p1 = pneg %p697_p0 }
 0x28f   : > { %788 = dma.done.wait (%p698_p1), %s624_s14, 64  }
 0x290   : > { %790 = vsyncadd (%p698_p1), %s624_s14, 4294967232  ;;  %p16_p2 = scmp.ge.s32.totalorder %s873_s27, 6   ;;  %s964_s21 = smov %s797_s22 }
 0x291   : > { %s965_s22 = smov %s801_s23  ;;  %s966_s23 = smov %s884_s30 }
 0x292   : > { %s967_s24 = smov %s873_s27  ;;  %18 = sbr.rel (!%p16_p2) target bundleno = 3 (0x3), region = 79 }
 0x297   :  { %629 = vsyncpa [#allocation3], 1 }
 0x298   :  { %631 = vsyncpa [#allocation3 + $0x1], 1 }

</bundles_post_ra>
